<compile_context>
chip_gen: v6e
topology: v6e:2x2x1
jax: 0.10.0
libtpu: 0.0.40
codegen_flags: <defaults>
</compile_context>

<pallas_src>
import functools
import math
import numbers

import numpy as np

import jax
import jax.numpy as jnp
from jax.experimental import pallas as pl
from jax.experimental.pallas import tpu as pltpu


# ---------------------------------------------------------------------------
# Pallas kernel: TB images per grid step, two MXU matmuls
# ---------------------------------------------------------------------------
def _resize_kernel(x_ref, ph_ref, pk_ref, o_ref, *, tb, h, pack_lanes):
    # x_ref : (TB*H, K)       native input dtype (uint8 / bf16 / f32)
    # ph_ref: (OH, H)         f32 row-pooling matrix
    # pk_ref: (K, OK)         f32 column-pooling matrix (already transposed)
    # o_ref : (1, OH, TB*OK)  if pack_lanes  else  (TB, OH, OK)
    x = x_ref[...].astype(jnp.float32)          # cast on the VMEM tile (VPU slack)
    ph = ph_ref[...]
    pk = pk_ref[...]
    ok = pk.shape[1]

    # Column pool: one merged MXU matmul, M = TB*H rows.
    y = jnp.dot(x, pk,
                precision=jax.lax.Precision.HIGHEST,
                preferred_element_type=jnp.float32)          # (TB*H, OK)

    # Row pool: small per-image 2-D matmuls (tb is capped, static unroll).
    for b in range(tb):
        ob = jnp.dot(ph, y[b * h:(b + 1) * h],
                     precision=jax.lax.Precision.HIGHEST,
                     preferred_element_type=jnp.float32)     # (OH, OK)
        if pack_lanes:
            # pack batch into the lane axis -> lane-dense HBM writeback
            o_ref[0, :, b * ok:(b + 1) * ok] = ob
        else:
            o_ref[b] = ob


def _choose_tb(B, H, K, OH, OK, in_bytes):
    """Images per grid step: divides B exactly, VMEM-budgeted, sublane-legal."""
    per_img = (2 * H * K * in_bytes      # double-buffered input block
               + H * K * 4               # f32 cast of the block
               + 2 * H * OK * 4          # column-pooled intermediate (+ slices)
               + 3 * OH * OK * 4)        # per-image results + output block (x2)
    fixed = 2 * (OH * H + K * OK) * 4    # Ph / Pk (double buffered)
    budget = 32 * 1024 * 1024            # conservative: fits v7x's 64 MiB VMEM
    cap = max(1, (budget - fixed) // per_img)
    cap = min(cap, 32, B)                # bound the unrolled per-image loop
    if B >= 2:
        cap = min(cap, B // 2)           # keep >= 2 grid steps (v7x has 2 TCs)
    cap = max(cap, 1)

    best = 0
    for t in range(cap, 0, -1):
        # exact division (no partial blocks) + (TB*H, K) block sublane-legal
        if B % t == 0 and (t * H) % 8 == 0:
            best = t
            break
    if best == 0:
        best = B                         # full-batch block is always layout-legal
    est = fixed + best * per_img
    return best, est


def _adaptive_avg_pool_pallas(x2d, B, H, ph, pk):
    """x2d: (B*H, K) native dtype; ph: (OH, H); pk: (K, OK) -> (B, OH, OK) f32."""
    OH = int(ph.shape[0])
    K, OK = int(pk.shape[0]), int(pk.shape[1])
    in_bytes = int(np.dtype(x2d.dtype).itemsize)

    TB, est = _choose_tb(B, H, K, OH, OK, in_bytes)
    nt = B // TB
    pack = OK < 128                       # lane-dense packing for narrow outputs

    kernel = functools.partial(_resize_kernel, tb=TB, h=H, pack_lanes=pack)

    # Ph / Pk have a constant block index -> fetched once by the pipeline and
    # kept resident.  TODO(synk): mark them pl.Buffered(1) once pipeline_mode is
    # uniformly supported (small VMEM saving only; accounted for in the budget).
    in_specs = [
        pl.BlockSpec((TB * H, K), lambda b: (b, 0)),
        pl.BlockSpec((OH, H), lambda b: (0, 0)),
        pl.BlockSpec((K, OK), lambda b: (0, 0)),
    ]
    if pack:
        out_shape = jax.ShapeDtypeStruct((nt, OH, TB * OK), jnp.float32)
        out_specs = pl.BlockSpec((1, OH, TB * OK), lambda b: (b, 0, 0))
    else:
        out_shape = jax.ShapeDtypeStruct((B, OH, OK), jnp.float32)
        out_specs = pl.BlockSpec((TB, OH, OK), lambda b: (b, 0, 0))

    vmem_limit = int(min(max(48 * 1024 * 1024, est * 5 // 4), 112 * 1024 * 1024))

    out = pl.pallas_call(
        kernel,
        out_shape=out_shape,
        grid_spec=pltpu.PrefetchScalarGridSpec(
            num_scalar_prefetch=0,
            grid=(nt,),
            in_specs=in_specs,
            out_specs=out_specs,
        ),
        compiler_params=pltpu.CompilerParams(
            dimension_semantics=("parallel",),
            vmem_limit_bytes=vmem_limit,
        ),
    )(x2d, ph, pk)

    if pack:
        # (nt, OH, TB*OK) -> (B, OH, OK); touches only the small downscaled output
        out = out.reshape(nt, OH, TB, OK)
        out = jnp.transpose(out, (0, 2, 1, 3)).reshape(B, OH, OK)
    return out


# ---------------------------------------------------------------------------
# Glue (plain JAX / numpy): pooling matrices, layout handling
# ---------------------------------------------------------------------------
def _pool_matrix(in_size: int, out_size: int) -> np.ndarray:
    """(out_size, in_size) matrix reproducing torch adaptive_avg_pool1d exactly."""
    m = np.zeros((out_size, in_size), dtype=np.float32)
    for o in range(out_size):
        start = (o * in_size) // out_size
        end = -((-(o + 1) * in_size) // out_size)   # ceil((o+1)*in/out)
        m[o, start:end] = 1.0 / float(end - start)
    return m


def image_resize_shortest_edge(img: jnp.ndarray, size: int,
                               channels_last: bool = False) -> jnp.ndarray:
    """JAX/Pallas port of habitat's image_resize_shortest_edge (mode='area')."""
    if img.ndim < 3 or img.ndim > 5:
        raise NotImplementedError()
    no_batch_dim = img.ndim == 3
    if no_batch_dim:
        img = img[None]

    if channels_last:
        lead = tuple(int(d) for d in img.shape[:-3])
        H, W, C = (int(d) for d in img.shape[-3:])
    else:
        lead = tuple(int(d) for d in img.shape[:-2])
        H, W = (int(d) for d in img.shape[-2:])
        C = 1
    B = 1
    for d in lead:
        B *= d

    scale = size / min(H, W)
    OH, OW = int(H * scale), int(W * scale)

    ph = jnp.asarray(_pool_matrix(H, OH))                     # (OH, H)
    pwt = np.ascontiguousarray(_pool_matrix(W, OW).T)         # (W, OW)
    if C > 1:
        # channels_last: pool the trailing (W, C) dims in place (no transposes)
        pk = np.kron(pwt, np.eye(C, dtype=np.float32))        # (W*C, OW*C)
    else:
        pk = pwt
    pk = jnp.asarray(pk)

    K, OK = W * C, OW * C
    x2d = img.reshape(B * H, K)     # free reshape: merges contiguous dims only

    out = _adaptive_avg_pool_pallas(x2d, B, H, ph, pk)        # (B, OH, OK) f32

    if channels_last:
        out = out.reshape(lead + (OH, OW, C))
    else:
        out = out.reshape(lead + (OH, OW))
    if no_batch_dim:
        out = out[0]
    # NOTE: reference op runs in float32 (input.float()); output stays float32.
    return out


class Resizer:
    """JAX/Pallas equivalent of the PyTorch Resizer module."""

    def __init__(self, size, channels_last: bool = False):
        if size is not None:
            if isinstance(size, numbers.Number):
                size = (int(size), int(size))
            assert len(size) == 2, "forced input size must be len of 2 (w, h)"
        self._size = size
        self.channels_last = channels_last

    def __call__(self, x: jnp.ndarray) -> jnp.ndarray:
        if self._size is None:
            return x
        return image_resize_shortest_edge(
            x, min(self._size), channels_last=self.channels_last)


# ---------------------------------------------------------------------------
if __name__ == "__main__":
    k0, k1, k2 = jax.random.split(jax.random.PRNGKey(0), 3)

    # 1) NCHW float32, shortest edge 16 -> 8 (lane-packed output path, TB=4).
    x = jax.random.normal(k0, (2, 4, 16, 16), dtype=jnp.float32)
    y = Resizer(size=(8, 8), channels_last=False)(x)
    jax.block_until_ready(y)
    ref = x.reshape(2, 4, 8, 2, 8, 2).mean(axis=(3, 5))
    assert y.shape == (2, 4, 8, 8), y.shape
    assert y.dtype == jnp.float32
    assert jnp.allclose(y, ref, atol=1e-5), float(jnp.max(jnp.abs(y - ref)))

    # 2) NHWC float32 (channels_last consumed in-layout, no HBM transposes).
    x_nhwc = jnp.transpose(x, (0, 2, 3, 1))
    y_nhwc = Resizer(size=8, channels_last=True)(x_nhwc)
    jax.block_until_ready(y_nhwc)
    assert y_nhwc.shape == (2, 8, 8, 4), y_nhwc.shape
    assert jnp.allclose(jnp.transpose(y_nhwc, (0, 3, 1, 2)), ref, atol=1e-5)

    # 3) NHWC uint8 rgb-like input (native-dtype DMA, in-kernel f32 cast).
    x_u8 = jax.random.randint(k1, (2, 16, 16, 3), 0, 256,
                              dtype=jnp.int32).astype(jnp.uint8)
    y_u8 = Resizer(size=8, channels_last=True)(x_u8)
    jax.block_until_ready(y_u8)
    ref_u8 = x_u8.astype(jnp.float32).reshape(2, 8, 2, 8, 2, 3).mean(axis=(2, 4))
    assert y_u8.shape == (2, 8, 8, 3), y_u8.shape
    assert y_u8.dtype == jnp.float32
    assert jnp.allclose(y_u8, ref_u8, atol=1e-3), float(jnp.max(jnp.abs(y_u8 - ref_u8)))

    # 4) Larger NCHW resize 256 -> 128 (unpacked lane-dense path, TB=4 merged M).
    x_big = jax.random.normal(k2, (2, 4, 256, 256), dtype=jnp.float32)
    y_big = Resizer(size=128)(x_big)
    jax.block_until_ready(y_big)
    ref_big = x_big.reshape(2, 4, 128, 2, 128, 2).mean(axis=(3, 5))
    assert y_big.shape == (2, 4, 128, 128), y_big.shape
    assert jnp.allclose(y_big, ref_big, atol=1e-4), float(jnp.max(jnp.abs(y_big - ref_big)))

    print("KERNEL_OK")
</pallas_src>

<mosaic_0001>
module attributes {stable_mosaic.version = 11 : i64} {
  func.func @_resize_kernel(%arg0: i32, %arg1: memref<64x16xf32, #tpu.memory_space<vmem>>, %arg2: memref<8x16xf32, #tpu.memory_space<vmem>>, %arg3: memref<16x8xf32, #tpu.memory_space<vmem>>, %arg4: memref<1x8x32xf32, #tpu.memory_space<vmem>>) attributes {dimension_semantics = [#tpu.dimension_semantics<parallel>], iteration_bounds = array<i64: 2>, scalar_prefetch = 0 : i64, scratch_operands = 0 : i64, tpu.core_type = #tpu.core_type<tc>, window_params = [{transform_indices = @transform_0, window_bounds = array<i64: 64, 16>}, {pipeline_mode = #tpu.pipeline_mode<synchronous>, transform_indices = @transform_1, window_bounds = array<i64: 8, 16>}, {pipeline_mode = #tpu.pipeline_mode<synchronous>, transform_indices = @transform_2, window_bounds = array<i64: 16, 8>}, {transform_indices = @transform_3, window_bounds = array<i64: 1, 8, 32>}]} {
    %c0 = arith.constant 0 : index
    %c0_0 = arith.constant 0 : index
    %0 = vector.load %arg1[%c0, %c0_0] : memref<64x16xf32, #tpu.memory_space<vmem>>, vector<64x16xf32>
    %c0_1 = arith.constant 0 : index
    %c0_2 = arith.constant 0 : index
    %1 = vector.load %arg2[%c0_1, %c0_2] : memref<8x16xf32, #tpu.memory_space<vmem>>, vector<8x16xf32>
    %c0_3 = arith.constant 0 : index
    %c0_4 = arith.constant 0 : index
    %2 = vector.load %arg3[%c0_3, %c0_4] : memref<16x8xf32, #tpu.memory_space<vmem>>, vector<16x8xf32>
    %cst = arith.constant dense<0.000000e+00> : vector<64x8xf32>
    %3 = tpu.matmul %0, %2, %cst {dimension_numbers = #tpu.dot_dimension_numbers<[1], [0], [0], [1], [0, 0, 1, 1], [], []>, precision = #tpu.contract_precision<fp32>} : vector<64x16xf32>, vector<16x8xf32>, vector<64x8xf32> -> vector<64x8xf32>
    %4 = vector.extract_strided_slice %3 {offsets = [0, 0], sizes = [16, 8], strides = [1, 1]} : vector<64x8xf32> to vector<16x8xf32>
    %cst_5 = arith.constant dense<0.000000e+00> : vector<8x8xf32>
    %5 = tpu.matmul %1, %4, %cst_5 {dimension_numbers = #tpu.dot_dimension_numbers<[1], [0], [0], [1], [0, 0, 1, 1], [], []>, precision = #tpu.contract_precision<fp32>} : vector<8x16xf32>, vector<16x8xf32>, vector<8x8xf32> -> vector<8x8xf32>
    %c0_6 = arith.constant 0 : index
    %c0_7 = arith.constant 0 : index
    %c0_8 = arith.constant 0 : index
    %6 = vector.load %arg4[%c0_6, %c0_7, %c0_8] : memref<1x8x32xf32, #tpu.memory_space<vmem>>, vector<1x8x8xf32>
    %7 = vector.shape_cast %6 : vector<1x8x8xf32> to vector<8x8xf32>
    %8 = vector.shape_cast %5 : vector<8x8xf32> to vector<1x8x8xf32>
    tpu.vector_store %arg4[%c0_6, %c0_7, %c0_8], %8 {strides = array<i32>} : memref<1x8x32xf32, #tpu.memory_space<vmem>>, vector<1x8x8xf32>,
    %9 = vector.extract_strided_slice %3 {offsets = [16, 0], sizes = [16, 8], strides = [1, 1]} : vector<64x8xf32> to vector<16x8xf32>
    %cst_9 = arith.constant dense<0.000000e+00> : vector<8x8xf32>
    %10 = tpu.matmul %1, %9, %cst_9 {dimension_numbers = #tpu.dot_dimension_numbers<[1], [0], [0], [1], [0, 0, 1, 1], [], []>, precision = #tpu.contract_precision<fp32>} : vector<8x16xf32>, vector<16x8xf32>, vector<8x8xf32> -> vector<8x8xf32>
    %c0_10 = arith.constant 0 : index
    %c0_11 = arith.constant 0 : index
    %c8 = arith.constant 8 : index
    %11 = vector.load %arg4[%c0_10, %c0_11, %c8] : memref<1x8x32xf32, #tpu.memory_space<vmem>>, vector<1x8x8xf32>
    %12 = vector.shape_cast %11 : vector<1x8x8xf32> to vector<8x8xf32>
    %13 = vector.shape_cast %10 : vector<8x8xf32> to vector<1x8x8xf32>
    tpu.vector_store %arg4[%c0_10, %c0_11, %c8], %13 {strides = array<i32>} : memref<1x8x32xf32, #tpu.memory_space<vmem>>, vector<1x8x8xf32>,
    %14 = vector.extract_strided_slice %3 {offsets = [32, 0], sizes = [16, 8], strides = [1, 1]} : vector<64x8xf32> to vector<16x8xf32>
    %cst_12 = arith.constant dense<0.000000e+00> : vector<8x8xf32>
    %15 = tpu.matmul %1, %14, %cst_12 {dimension_numbers = #tpu.dot_dimension_numbers<[1], [0], [0], [1], [0, 0, 1, 1], [], []>, precision = #tpu.contract_precision<fp32>} : vector<8x16xf32>, vector<16x8xf32>, vector<8x8xf32> -> vector<8x8xf32>
    %c0_13 = arith.constant 0 : index
    %c0_14 = arith.constant 0 : index
    %c16 = arith.constant 16 : index
    %16 = vector.load %arg4[%c0_13, %c0_14, %c16] : memref<1x8x32xf32, #tpu.memory_space<vmem>>, vector<1x8x8xf32>
    %17 = vector.shape_cast %16 : vector<1x8x8xf32> to vector<8x8xf32>
    %18 = vector.shape_cast %15 : vector<8x8xf32> to vector<1x8x8xf32>
    tpu.vector_store %arg4[%c0_13, %c0_14, %c16], %18 {strides = array<i32>} : memref<1x8x32xf32, #tpu.memory_space<vmem>>, vector<1x8x8xf32>,
    %19 = vector.extract_strided_slice %3 {offsets = [48, 0], sizes = [16, 8], strides = [1, 1]} : vector<64x8xf32> to vector<16x8xf32>
    %cst_15 = arith.constant dense<0.000000e+00> : vector<8x8xf32>
    %20 = tpu.matmul %1, %19, %cst_15 {dimension_numbers = #tpu.dot_dimension_numbers<[1], [0], [0], [1], [0, 0, 1, 1], [], []>, precision = #tpu.contract_precision<fp32>} : vector<8x16xf32>, vector<16x8xf32>, vector<8x8xf32> -> vector<8x8xf32>
    %c0_16 = arith.constant 0 : index
    %c0_17 = arith.constant 0 : index
    %c24 = arith.constant 24 : index
    %21 = vector.load %arg4[%c0_16, %c0_17, %c24] : memref<1x8x32xf32, #tpu.memory_space<vmem>>, vector<1x8x8xf32>
    %22 = vector.shape_cast %21 : vector<1x8x8xf32> to vector<8x8xf32>
    %23 = vector.shape_cast %20 : vector<8x8xf32> to vector<1x8x8xf32>
    tpu.vector_store %arg4[%c0_16, %c0_17, %c24], %23 {strides = array<i32>} : memref<1x8x32xf32, #tpu.memory_space<vmem>>, vector<1x8x8xf32>,
    return
  }
  func.func @transform_0(%arg0: i32) -> (i32, i32) {
    %c0_i32 = arith.constant 0 : i32
    %c0_i32_0 = arith.constant 0 : i32
    return %arg0, %c0_i32 : i32, i32
  }
  func.func @transform_1(%arg0: i32) -> (i32, i32) {
    %c0_i32 = arith.constant 0 : i32
    %c0_i32_0 = arith.constant 0 : i32
    %c0_i32_1 = arith.constant 0 : i32
    return %c0_i32, %c0_i32_0 : i32, i32
  }
  func.func @transform_2(%arg0: i32) -> (i32, i32) {
    %c0_i32 = arith.constant 0 : i32
    %c0_i32_0 = arith.constant 0 : i32
    %c0_i32_1 = arith.constant 0 : i32
    return %c0_i32, %c0_i32_0 : i32, i32
  }
  func.func @transform_3(%arg0: i32) -> (i32, i32, i32) {
    %c0_i32 = arith.constant 0 : i32
    %c0_i32_0 = arith.constant 0 : i32
    %c0_i32_1 = arith.constant 0 : i32
    return %arg0, %c0_i32, %c0_i32_0 : i32, i32, i32
  }
}

</mosaic_0001>

<bundles_post_ra>
// kernel: tpu_custom_call.1
= control target key start
LH: loop header
LB: loop body
LE: loop exit
PB: predicated region body
PF: predicated region fallthrough
CT: control target
= control target key end

     0   :  { %8 = vsyncpa [#allocation3], 0  ;;  %s3899_s0 = inlined_call_operand.vmem [shape: f32[128,16], index: 0, kind: input, shape index: {}]   ;;  %s3900_s1 = inlined_call_operand.vmem [shape: f32[8,16], index: 1, kind: input, shape index: {}]   ;;  %s3901_s2 = inlined_call_operand.vmem [shape: f32[16,8], index: 2, kind: input, shape index: {}]   ;;  %s3902_s3 = inlined_call_operand.hbm [shape: f32[2,8,32], index: 3, kind: output, shape index: {}]  }
   0x1   :  { %10 = vsyncpa [#allocation3 + $0x1], 0  ;;  %s3438_s12 = smov 0   ;;  %s3440_s13 = smov 0  }
   0x2   :  { %s3442_s14 = smov 0   ;;  %s3444_s15 = smov 0  }
   0x3 LB: > { %s3459_s16 = sadd.s32 4294967295, %s3410_s15   ;;  %s2899_s17 = sadd.s32 4294967294, %s3410_s15   ;;  %s3410_s15 = sphi %s3444_s15, %s3908_s15   ;;  %s3406_s14 = sphi %s3442_s14, %s3907_s14   ;;  %s3402_s13 = sphi %s3440_s13, %s3906_s13   ;;  %s3398_s12 = sphi %s3438_s12, %s3905_s12  }
   0x4   : > { %s3463_s18 = sadd.s32 1, %s3410_s15   ;;  %s91_s19 = sadd.s32 1, %s3406_s14 }
   0x5   : > { %s88_s20 = ssub.s32 %s3410_s15, %s3463_s18  ;;  %p101_p0 = scmp.ne.s32.totalorder %s3406_s14, %s3402_s13 }
   0x6   : > { %p89_p1 = scmp.eq.s32.totalorder %s88_s20, 0  ;;  %p102_p2 = scmp.eq.s32.totalorder %s3459_s16, 1 }
   0x7   : > { %p107_p3 = scmp.ne.s32.totalorder %s3402_s13, %s3398_s12  ;;  %p108_p4 = scmp.eq.s32.totalorder %s2899_s17, 1 }
   0x8   : > { %s3474_s21 = scalar_select %p89_p1, %s3406_s14, %s91_s19  }
   0x9   : > { %p3476_p5 = por %p102_p2, %p101_p0  ;;  %p3480_p6 = por %p108_p4, %p107_p3 }
   0xa   : > { %p2902_p7 = scmp.ge.s32.totalorder %s3410_s15, 1  ;;  %p141_p8 = scmp.lt.s32.totalorder %s3410_s15, 3 }
   0xc   : > { %p142_p9 = pnand %p2902_p7, %p141_p8 }
   0xd   : > { %s2904_s28 = sshll.u32 (!%p142_p9), %s3459_s16, 3  ;;  %s162_s8 = sand.u32 (!%p142_p9), 1, %s3402_s13  }
   0xe   : > { %145 = sbr.rel (%p142_p9) target bundleno = 666 (0x29a), region = 32  ;;  %p166_p10 = scmp.lt.s32.totalorder (!%p142_p9), %s2904_s28, 15 }
   0xf   : > { %s2903_s9 = sshll.u32 (!%p142_p9), %s162_s8, 3  ;;  %s3414_s11 = smov (!%p142_p9), 8  }
  0x10   : > { %s3851_s10 = scalar_lea.vmem (!%p142_p9), [#allocation2], %s2903_s9  ;;  %s3415_s17 = smov (!%p142_p9), 16  }
  0x11   : > { %s3416_s19 = smov (!%p142_p9), 24   ;;  %s2907_s20 = sshll.u32 (!%p142_p9), %s3459_s16, 7 }
  0x12   : > { %s2840_s24 = sshll.u32 (!%p142_p9), %s3851_s10, 4  ;;  %s3861_s27 = scalar_lea.hbm (!%p142_p9), %s3902_s3, %s2907_s20  ;;  %s2841_s24 = int_to_ptr.vmem [resolvable:$true] %s2840_s24 }
  0x13   : > { %v181_v0 = vld [vmem:[%s3901_s2 + $0x8] sm:$0xff]  ;;  %v180_v1 = vld [vmem:[%s3901_s2] sm:$0xff]  ;;  %s3910_s28 = smov (!%p166_p10, %s2904_s28), 15  ;;  %vm182_vm0 = vcmask 130048   ;;  %vm3413_vm1 = vmmov 0   ;;  %vm1429_vm2 = vcmask 64512  }
  0x14   : > { %v3493_v2 = vand.u32 4294901760, %v181_v0  ;;  %v3495_v3 = vand.u32 4294901760, %v180_v1  ;;  %s2905_s29 = sshll.u32 %s3910_s28, 3  ;;  %vm1894_vm3 = vcmask 130112   ;;  %vm2359_vm4 = vcmask 195712   ;;  %s2827_s28 = scalar_lea.sflag [#allocation3], %s162_s8 }
  0x15   : > { %s169_s5 = scalar_lea.vmem %s3899_s0, %s2905_s29  ;;  %vm2824_vm5 = vcmask 261312   ;;  %s3350_s29 = scalar_lea.vmem %s2841_s24, 128 }
  0x16   : > { %3042 = vmatprep.subr.mxu0 %v3493_v2  ;;  %v3499_v4 = vsub.f32 %v181_v0, %v3493_v2  ;;  %v3502_v5 = vsub.f32 %v180_v1, %v3495_v3  ;;  %v171_v10 = vld [vmem:[%s169_s5] sm:$0xff]  ;;  %v172_v11 = vld [vmem:[%s169_s5 + $0x8] sm:$0xff]  ;;  %v173_v12 = vld [vmem:[%s169_s5 + $0x10] sm:$0xff]  ;;  %p3351_p11 = scmp.ne.s32.totalorder %s2841_s24, %s3350_s29  ;;  %s3417_s30 = smov [#allocation2]  }
  0x17   : > { %3043 = vmatpush3.msra.mxu0 %v3493_v2  ;;  %v184_v13 = vsel %vm182_vm0, %v171_v10, 0  ;;  %v187_v14 = vsel %vm182_vm0, %v172_v11, 0  ;;  %v190_v15 = vsel %vm182_vm0, %v173_v12, 0  ;;  %v174_v16 = vld [vmem:[%s169_s5 + $0x18] sm:$0xff]  ;;  %v175_v17 = vld [vmem:[%s169_s5 + $0x20] sm:$0xff]  ;;  %v176_v18 = vld [vmem:[%s169_s5 + $0x28] sm:$0xff] }
  0x18   : > { %v3506_v6 = vand.u32 4294901760, %v3499_v4  ;;  %3044 = vmatprep.subr.mxu0 %v3495_v3  ;;  %v3510_v7 = vand.u32 4294901760, %v3502_v5  ;;  %v3524_v21 = vand.u32 4294901760, %v184_v13  ;;  %v3526_v22 = vand.u32 4294901760, %v187_v14  ;;  %v177_v23 = vld [vmem:[%s169_s5 + $0x30] sm:$0xff]  ;;  %v178_v24 = vld [vmem:[%s169_s5 + $0x38] sm:$0xff]  ;;  %p3352_p12 = pnand %p3351_p11, %p3476_p5 }
  0x19   : > { %3045 = vmatpush3.msra.mxu0 %v3495_v3  ;;  %v3528_v25 = vand.u32 4294901760, %v190_v15  ;;  %v193_v26 = vsel %vm182_vm0, %v174_v16, 0  ;;  %v196_v27 = vsel %vm182_vm0, %v175_v17, 0  ;;  %v199_v28 = vsel %vm182_vm0, %v176_v18, 0  ;;  %s3354_s4 = sshll.u32 %s3417_s30, 4  ;;  %s3355_s4 = int_to_ptr.vmem [resolvable:$false] %s3354_s4 }
  0x1a   : > { %v386_v8 = vsub.f32 %v3499_v4, %v3506_v6  ;;  %v393_v9 = vsub.f32 %v3502_v5, %v3510_v7  ;;  %3074 = vmatprep.subr.mxu0 %v3499_v4  ;;  %v3534_v29 = vsub.f32 %v184_v13, %v3524_v21  ;;  %3062 = vmatprep.mubr.f32.mxu1 %v3524_v21  ;;  %v3540_v31 = vand.u32 4294901760, %v193_v26  ;;  %p3353_p13 = pneg %p3352_p12  ;;  %s3356_s16 = scalar_lea.vmem %s3355_s4, 256 }
  0x1b   : > { %v3538_v30 = vsub.f32 %v187_v14, %v3526_v22  ;;  %v3542_v32 = vand.u32 4294901760, %v196_v27  ;;  %v3545_v33 = vsub.f32 %v190_v15, %v3528_v25  ;;  %v3547_v34 = vand.u32 4294901760, %v199_v28  ;;  %p3357_p0 = scmp.lt.s32.totalorder %s2841_s24, %s3355_s4  ;;  %p3358_p1 = scmp.lt.s32.totalorder %s3356_s16, %s3350_s29 }
  0x1c   : > { %v387_v19 = vand.u32 4294901760, %v386_v8  ;;  %v394_v20 = vand.u32 4294901760, %v393_v9  ;;  %v202_v35 = vsel %vm182_vm0, %v177_v23, 0  ;;  %v205_v36 = vsel %vm182_vm0, %v178_v24, 0 }
  0x1d   : > { %v276_v37 = vand.u32 4294901760, %v3534_v29  ;;  %v286_v38 = vand.u32 4294901760, %v3538_v30  ;;  %v3554_v39 = vsub.f32 %v193_v26, %v3540_v31  ;;  %v3557_v40 = vsub.f32 %v196_v27, %v3542_v32  ;;  %p3359_p2 = por %p3358_p1, %p3357_p0 }
  0x1e   : > { %3058 = vmatprep.subr.mxu1 %v387_v19  ;;  %v296_v41 = vand.u32 4294901760, %v3545_v33  ;;  %v3561_v42 = vsub.f32 %v199_v28, %v3547_v34  ;;  %v3563_v43 = vand.u32 4294901760, %v202_v35  ;;  %v3565_v44 = vand.u32 4294901760, %v205_v36 }
  0x1f   : > { %3059 = vmatpush3.msra.mxu1 %v387_v19  ;;  %v277_v45 = vsub.f32 %v3534_v29, %v276_v37  ;;  %v287_v46 = vsub.f32 %v3538_v30, %v286_v38  ;;  %v306_v47 = vand.u32 4294901760, %v3554_v39  ;;  %v316_v48 = vand.u32 4294901760, %v3557_v40  ;;  %p3360_p3 = pnand %p3359_p2, %p3353_p13 }
  0x20   : > { %3060 = vmatprep.subr.mxu1 %v394_v20  ;;  %v297_v49 = vsub.f32 %v3545_v33, %v296_v41  ;;  %v326_v50 = vand.u32 4294901760, %v3561_v42  ;;  %v335_v51 = vsub.f32 %v202_v35, %v3563_v43  ;;  %v345_v52 = vsub.f32 %v205_v36, %v3565_v44 }
  0x21   : > { %3061 = vmatpush3.msra.mxu1 %v394_v20  ;;  %v278_v53 = vand.u32 4294901760, %v277_v45  ;;  %v288_v54 = vand.u32 4294901760, %v287_v46  ;;  %v307_v55 = vsub.f32 %v3554_v39, %v306_v47  ;;  %v317_v56 = vsub.f32 %v3557_v40, %v316_v48 }
  0x22   : > { %3063 = vmatmul.mubr.f32.vlgmr.msra.gmra.mxu1 %v3526_v22  ;;  %3090 = vmatprep.subr.mxu1 %v3493_v2  ;;  %v298_v57 = vand.u32 4294901760, %v297_v49  ;;  %v336_v58 = vand.u32 4294901760, %v335_v51  ;;  %v327_v60 = vsub.f32 %v3561_v42, %v326_v50  ;;  %v346_v61 = vand.u32 4294901760, %v345_v52 }
  0x23   : > { %3065 = vmatprep.mubr.f32.mxu1 %v3528_v25  ;;  %3091 = vmatpush3.msra.mxu1 %v3493_v2  ;;  %v308_v59 = vand.u32 4294901760, %v307_v55  ;;  %v318_v62 = vand.u32 4294901760, %v317_v56 }
  0x24   : > { %3092 = vmatprep.subr.mxu1 %v3495_v3  ;;  %3046 = vmatprep.mubr.f32.mxu0 %v278_v53  ;;  %v337_v63 = vsub.f32 %v335_v51, %v336_v58  ;;  %v328_v0 = vand.u32 4294901760, %v327_v60  ;;  %v347_v1 = vsub.f32 %v345_v52, %v346_v61 }
  0x25   : > { %3093 = vmatpush3.msra.mxu1 %v3495_v3  ;;  %3047 = vmatmul.mubr.f32.vlgmr.msra.gmra.mxu0 %v288_v54 }
  0x26   : > { %3066 = vmatmul.mubr.f32.gmra.mxu1 %v3540_v31  ;;  %3049 = vmatprep.mubr.f32.mxu0 %v298_v57  ;;  %v338_v8 = vand.u32 4294901760, %v337_v63 }
  0x27   : > { %3068 = vmatprep.mubr.f32.mxu1 %v3542_v32  ;;  %3075 = vmatpush3.msra.mxu0 %v3499_v4  ;;  %v348_v4 = vand.u32 4294901760, %v347_v1 }
  0x28   : > { %3076 = vmatprep.subr.mxu0 %v3502_v5  ;;  %3122 = vmatprep.subr.mxu1 %v3493_v2 }
  0x29   : > { %3077 = vmatpush3.msra.mxu0 %v3502_v5 }
  0x2a   : > { %3069 = vmatmul.mubr.f32.gmra.mxu1 %v3547_v34  ;;  %3050 = vmatmul.mubr.f32.gmra.mxu0 %v308_v59 }
  0x2b   : > { %3071 = vmatprep.mubr.f32.mxu1 %v3563_v43  ;;  %3052 = vmatprep.mubr.f32.mxu0 %v318_v62 }
  0x2c   : > { %3106 = vmatprep.subr.mxu0 %v3506_v6 }
  0x2e   : > { %3072 = vmatmul.mubr.f32.gmra.mxu1 %v3565_v44  ;;  %3053 = vmatmul.mubr.f32.gmra.mxu0 %v328_v0 }
  0x2f   : > { %3094 = vmatprep.mubr.f32.mxu1 %v276_v37  ;;  %3055 = vmatprep.mubr.f32.mxu0 %v338_v8 }
  0x32   : > { %3095 = vmatmul.mubr.f32.vlgmr.msra.gmra.mxu1 %v286_v38  ;;  %3056 = vmatmul.mubr.f32.gmra.mxu0 %v348_v4 }
  0x33   : > { %3097 = vmatprep.mubr.f32.mxu1 %v296_v41  ;;  %3078 = vmatprep.mubr.f32.mxu0 %v3534_v29 }
  0x34   : > { %3123 = vmatpush3.msra.mxu1 %v3493_v2  ;;  %v3412_v2 = vmov 0.0  }
  0x35   : > { %3124 = vmatprep.subr.mxu1 %v3495_v3 }
  0x36   : > { %3098 = vmatmul.mubr.f32.gmra.mxu1 %v306_v47  ;;  %3079 = vmatmul.mubr.f32.vlgmr.msra.gmra.mxu0 %v3538_v30 }
  0x37   : > { %3100 = vmatprep.mubr.f32.mxu1 %v316_v48  ;;  %3081 = vmatprep.mubr.f32.mxu0 %v3545_v33 }
  0x38   : > { %3107 = vmatpush3.msra.mxu0 %v3506_v6  ;;  %3125 = vmatpush3.msra.mxu1 %v3495_v3 }
  0x39   : > { %3108 = vmatprep.subr.mxu0 %v3510_v7  ;;  %3145 = vmatprep.subr.mxu1 %v3412_v2 }
  0x3a   : > { %3101 = vmatmul.mubr.f32.gmra.mxu1 %v326_v50  ;;  %3109 = vmatpush3.msra.mxu0 %v3510_v7 }
  0x3b   : > { %3082 = vmatmul.mubr.f32.gmra.mxu0 %v3554_v39  ;;  %3103 = vmatprep.mubr.f32.mxu1 %v336_v58 }
  0x3c   : > { %3084 = vmatprep.mubr.f32.mxu0 %v3557_v40  ;;  %3138 = vmatprep.subr.mxu0 %v3412_v2 }
  0x3e   : > { %3104 = vmatmul.mubr.f32.gmra.mxu1 %v346_v61 }
  0x3f   : > { %3085 = vmatmul.mubr.f32.gmra.mxu0 %v3561_v42  ;;  %3126 = vmatprep.mubr.f32.mxu1 %v3524_v21 }
  0x40   : > { %3087 = vmatprep.mubr.f32.mxu0 %v335_v51 }
  0x42   : > { %3127 = vmatmul.mubr.f32.vlgmr.msra.gmra.mxu1 %v3526_v22 }
  0x43   : > { %3088 = vmatmul.mubr.f32.gmra.mxu0 %v345_v52  ;;  %3129 = vmatprep.mubr.f32.mxu1 %v3528_v25 }
  0x44   : > { %3110 = vmatprep.mubr.f32.mxu0 %v3524_v21 }
  0x46   : > { %3130 = vmatmul.mubr.f32.gmra.mxu1 %v3540_v31 }
  0x47   : > { %3111 = vmatmul.mubr.f32.vlgmr.msra.gmra.mxu0 %v3526_v22  ;;  %3132 = vmatprep.mubr.f32.mxu1 %v3542_v32 }
  0x48   : > { %3113 = vmatprep.mubr.f32.mxu0 %v3528_v25  ;;  %v179_v25 = vld [vmem:[%s3900_s1] sm:$0xff] }
  0x49   : > { %v968_v29 = vsel %vm182_vm0, %v179_v25, 0 }
  0x4a   : > { %3133 = vmatmul.mubr.f32.gmra.mxu1 %v3547_v34  ;;  %v3652_v33 = vand.u32 4294901760, %v968_v29 }
  0x4b   : > { %3114 = vmatmul.mubr.f32.gmra.mxu0 %v3540_v31  ;;  %3135 = vmatprep.mubr.f32.mxu1 %v3563_v43 }
  0x4c   : > { %3116 = vmatprep.mubr.f32.mxu0 %v3542_v32  ;;  %v3661_v38 = vsub.f32 %v968_v29, %v3652_v33 }
  0x4e   : > { %3136 = vmatmul.mubr.f32.gmra.mxu1 %v3565_v44  ;;  %v3670_v46 = vand.u32 4294901760, %v3661_v38 }
  0x4f   : > { %3117 = vmatmul.mubr.f32.gmra.mxu0 %v3547_v34  ;;  %3149 = vmatprep.mubr.msk.f32.mxu1 %vm3413_vm1, %v3412_v2 }
  0x50   : > { %3119 = vmatprep.mubr.f32.mxu0 %v3563_v43  ;;  %v1040_v56 = vsub.f32 %v3661_v38, %v3670_v46 }
  0x53   : > { %3120 = vmatmul.mubr.f32.gmra.mxu0 %v3565_v44 }
  0x54   : > { %3142 = vmatprep.mubr.msk.f32.mxu0 %vm3413_vm1, %v3412_v2 }
  0xe2   : > { %v3064_v3 = vpop.f32.mrf.mxu1 }
  0xe4   : > { %v431_v5 = vpop.f32.mrf.mxu1 }
  0xe5   : > { %v3048_v7 = vpop.f32.mrf.mxu0 }
  0xe6   : > { %v3067_v6 = vpop.f32.mrf.mxu1  ;;  %v438_v36 = vadd.f32 %v3064_v3, %v3048_v7  ;;  %v3676_v3 = vand.u32 4294901760, %v1040_v56 }
  0xe7   : > { %v280_v10 = vpop.f32.mrf.mxu0 }
  0xe8   : > { %v443_v9 = vpop.f32.mrf.mxu1  ;;  %v432_v39 = vadd.f32 %v431_v5, %v280_v10 }
  0xea   : > { %v3628_v11 = vpop.f32.mrf.mxu1  ;;  %v3051_v12 = vpop.f32.mrf.mxu0 }
  0xeb   : > { %v450_v44 = vadd.f32 %v3067_v6, %v3051_v12 }
  0xec   : > { %v3630_v13 = vpop.f32.mrf.mxu1  ;;  %v300_v14 = vpop.f32.mrf.mxu0 }
  0xed   : > { %v444_v49 = vadd.f32 %v443_v9, %v300_v14 }
  0xee   : > { %v3632_v15 = vpop.f32.mrf.mxu1  ;;  %v3634_v16 = vpop.f32.mrf.mxu0 }
  0xf0   : > { %v3636_v17 = vpop.f32.mrf.mxu1  ;;  %v3638_v18 = vpop.f32.mrf.mxu0 }
  0xf2   : > { %v3096_v19 = vpop.f32.mrf.mxu1  ;;  %v3640_v20 = vpop.f32.mrf.mxu0 }
  0xf4   : > { %v673_v21 = vpop.f32.mrf.mxu1  ;;  %v3642_v22 = vpop.f32.mrf.mxu0 }
  0xf6   : > { %v3099_v23 = vpop.f32.mrf.mxu1  ;;  %v3080_v24 = vpop.f32.mrf.mxu0 }
  0xf7   : > { %v557_v40 = vadd.f32 %v3080_v24, %v438_v36 }
  0xf8   : > { %v689_v26 = vpop.f32.mrf.mxu1  ;;  %v549_v27 = vpop.f32.mrf.mxu0 }
  0xf9   : > { %v550_v43 = vadd.f32 %v549_v27, %v432_v39  ;;  %v682_v47 = vadd.f32 %v3096_v19, %v557_v40  ;;  %v462_v27 = vadd.f32 %v3628_v11, %v3634_v16 }
  0xfa   : > { %v3647_v28 = vpop.f32.mrf.mxu1 }
  0xfb   : > { %v3083_v30 = vpop.f32.mrf.mxu0  ;;  %v674_v52 = vadd.f32 %v673_v21, %v550_v43 }
  0xfc   : > { %v3650_v31 = vpop.f32.mrf.mxu1  ;;  %v571_v50 = vadd.f32 %v3083_v30, %v450_v44 }
  0xfd   : > { %v563_v32 = vpop.f32.mrf.mxu0 }
  0xfe   : > { %v3654_v34 = vpop.f32.mrf.mxu1  ;;  %v564_v54 = vadd.f32 %v563_v32, %v444_v49  ;;  %v698_v60 = vadd.f32 %v3099_v23, %v571_v50  ;;  %v456_v32 = vadd.f32 %v3630_v13, %v3638_v18 }
  0xff   : > { %v3656_v35 = vpop.f32.mrf.mxu0 }
 0x100   : > { %v3663_v41 = vpop.f32.mrf.mxu1  ;;  %v690_v1 = vadd.f32 %v689_v26, %v564_v54  ;;  %v585_v36 = vadd.f32 %v3656_v35, %v462_v27 }
 0x101   : > { %v3658_v37 = vpop.f32.mrf.mxu0 }
 0x102   : > { %v3128_v48 = vpop.f32.mrf.mxu1  ;;  %v578_v16 = vadd.f32 %v3658_v37, %v456_v32  ;;  %v714_v13 = vadd.f32 %v3647_v28, %v585_v36 }
 0x103   : > { %v3665_v42 = vpop.f32.mrf.mxu0 }
 0x104   : > { %v921_v59 = vpop.f32.mrf.mxu1  ;;  %v706_v37 = vadd.f32 %v3650_v31, %v578_v16 }
 0x105   : > { %v3667_v45 = vpop.f32.mrf.mxu0 }
 0x106   : > { %v3131_v0 = vpop.f32.mrf.mxu1 }
 0x107   : > { %v3112_v51 = vpop.f32.mrf.mxu0 }
 0x108   : > { %v813_v53 = vadd.f32 %v3112_v51, %v682_v47  ;;  %v933_v12 = vpop.f32.mrf.mxu1 }
 0x109   : > { %v806_v55 = vpop.f32.mrf.mxu0 }
 0x10a   : > { %v928_v57 = vadd.f32 %v3128_v48, %v813_v53  ;;  %v807_v58 = vadd.f32 %v806_v55, %v674_v52  ;;  %v3134_v43 = vpop.f32.mrf.mxu1  ;;  %v474_v55 = vadd.f32 %v3632_v15, %v3640_v20 }
 0x10b   : > { %v3115_v61 = vpop.f32.mrf.mxu0 }
 0x10c   : > { %v3674_v62 = vand.u32 4294901760, %v928_v57  ;;  %v922_v63 = vadd.f32 %v921_v59, %v807_v58  ;;  %v825_v8 = vadd.f32 %v3115_v61, %v698_v60  ;;  %v945_v49 = vpop.f32.mrf.mxu1  ;;  %v599_v58 = vadd.f32 %v3665_v42, %v474_v55 }
 0x10d   : > { %v818_v4 = vpop.f32.mrf.mxu0 }
 0x10e   : > { %v1077_v5 = vsub.f32 %v928_v57, %v3674_v62  ;;  %v3679_v6 = vand.u32 4294901760, %v922_v63  ;;  %3139 = vmatpush3.msra.mxu0 %v3674_v62  ;;  %v819_v7 = vadd.f32 %v818_v4, %v690_v1  ;;  %v940_v14 = vadd.f32 %v3131_v0, %v825_v8  ;;  %v3137_v61 = vpop.f32.mrf.mxu1 }
 0x10f   : > { %3140 = vmatprep.subr.mxu0 %v3412_v2  ;;  %v3118_v11 = vpop.f32.mrf.mxu0  ;;  %v468_v57 = vadd.f32 %v3636_v17, %v3642_v22  ;;  %v730_v17 = vadd.f32 %v3654_v34, %v599_v58 }
 0x110   : > { %v1078_v9 = vand.u32 4294901760, %v1077_v5  ;;  %v1084_v10 = vsub.f32 %v922_v63, %v3679_v6  ;;  %3141 = vmatpush3.msra.mxu0 %v3679_v6  ;;  %v934_v23 = vadd.f32 %v933_v12, %v819_v7  ;;  %v3690_v25 = vand.u32 4294901760, %v940_v14  ;;  %v957_v1 = vpop.f32.mrf.mxu1 }
 0x111   : > { %3152 = vmatprep.subr.mxu0 %v3412_v2  ;;  %3143 = vmatmul.mubr.f32.vlgmr.msra.gmra.mxu0 %v3676_v3  ;;  %v830_v35 = vpop.f32.mrf.mxu0  ;;  %v837_v44 = vadd.f32 %v3118_v11, %v714_v13  ;;  %v592_v20 = vadd.f32 %v3667_v45, %v468_v57 }
 0x112   : > { %v1079_v19 = vsub.f32 %v1077_v5, %v1078_v9  ;;  %v1085_v21 = vand.u32 4294901760, %v1084_v10  ;;  %3153 = vmatpush3.msra.mxu0 %v1077_v5  ;;  %3156 = vmatprep.mubr.msk.f32.mxu0 %vm3413_vm1, %v3412_v2  ;;  %v3698_v29 = vand.u32 4294901760, %v934_v23  ;;  %v1538_v39 = vsub.f32 %v940_v14, %v3690_v25 }
 0x113   : > { %3154 = vmatprep.subr.mxu0 %v3412_v2  ;;  %v831_v48 = vadd.f32 %v830_v35, %v706_v37  ;;  %v952_v50 = vadd.f32 %v3134_v43, %v837_v44  ;;  %v3121_v15 = vpop.f32.mrf.mxu0  ;;  %v722_v45 = vadd.f32 %v3663_v41, %v592_v20 }
 0x114   : > { %v1086_v24 = vsub.f32 %v1084_v10, %v1085_v21  ;;  %3155 = vmatpush3.msra.mxu0 %v1084_v10  ;;  %v1080_v26 = vand.u32 4294901760, %v1079_v19  ;;  %v1545_v40 = vsub.f32 %v934_v23, %v3698_v29  ;;  %v1539_v18 = vand.u32 4294901760, %v1538_v39 }
 0x115   : > { %3166 = vmatprep.subr.mxu0 %v3412_v2  ;;  %3157 = vmatmul.mubr.f32.vlgmr.msra.gmra.mxu0 %v3661_v38  ;;  %v946_v51 = vadd.f32 %v945_v49, %v831_v48  ;;  %v3739_v53 = vand.u32 4294901760, %v952_v50  ;;  %v842_v42 = vpop.f32.mrf.mxu0 }
 0x116   : > { %3167 = vmatpush3.msra.mxu0 %v1078_v9  ;;  %3170 = vmatprep.mubr.msk.f32.mxu0 %vm3413_vm1, %v3412_v2  ;;  %v1087_v30 = vand.u32 4294901760, %v1086_v24  ;;  %v1546_v47 = vand.u32 4294901760, %v1545_v40  ;;  %v1540_v28 = vsub.f32 %v1538_v39, %v1539_v18  ;;  %v843_v0 = vadd.f32 %v842_v42, %v722_v45 }
 0x117   : > { %3146 = vmatpush3.msra.mxu1 %v1080_v26  ;;  %3168 = vmatprep.subr.mxu0 %v3412_v2  ;;  %v3745_v56 = vand.u32 4294901760, %v946_v51  ;;  %v2003_v59 = vsub.f32 %v952_v50, %v3739_v53 }
 0x118   : > { %3147 = vmatprep.subr.mxu1 %v3412_v2  ;;  %3169 = vmatpush3.msra.mxu0 %v1085_v21  ;;  %v1547_v31 = vsub.f32 %v1545_v40, %v1546_v47  ;;  %v1541_v52 = vand.u32 4294901760, %v1540_v28  ;;  %v958_v4 = vadd.f32 %v957_v1, %v843_v0 }
 0x119   : > { %3148 = vmatpush3.msra.mxu1 %v1087_v30  ;;  %3180 = vmatprep.subr.mxu0 %v3412_v2  ;;  %v2010_v60 = vsub.f32 %v946_v51, %v3745_v56  ;;  %v2004_v22 = vand.u32 4294901760, %v2003_v59 }
 0x11a   : > { %3159 = vmatprep.subr.mxu1 %v3412_v2  ;;  %3150 = vmatmul.mubr.f32.vlgmr.msra.gmra.mxu1 %v3652_v33  ;;  %v1548_v54 = vand.u32 4294901760, %v1547_v31  ;;  %v2393_v9 = vand.u32 4294901760, %v958_v4 }
 0x11b   : > { %3160 = vmatpush3.msra.mxu1 %v3674_v62  ;;  %3171 = vmatmul.mubr.f32.vlgmr.msra.gmra.mxu0 %v3652_v33  ;;  %v2011_v63 = vand.u32 4294901760, %v2010_v60  ;;  %v2005_v34 = vsub.f32 %v2003_v59, %v2004_v22 }
 0x11c   : > { %3181 = vmatpush3.msra.mxu0 %v3690_v25  ;;  %3161 = vmatprep.subr.mxu1 %v3412_v2  ;;  %v2475_v12 = vsub.f32 %v958_v4, %v2393_v9 }
 0x11d   : > { %3182 = vmatprep.subr.mxu0 %v3412_v2  ;;  %3162 = vmatpush3.msra.mxu1 %v3679_v6  ;;  %v2012_v41 = vsub.f32 %v2010_v60, %v2011_v63  ;;  %v2006_v5 = vand.u32 4294901760, %v2005_v34 }
 0x11e   : > { %3183 = vmatpush3.msra.mxu0 %v3698_v29  ;;  %3163 = vmatprep.mubr.msk.f32.mxu1 %vm3413_vm1, %v3412_v2  ;;  %v2476_v19 = vand.u32 4294901760, %v2475_v12 }
 0x11f   : > { %3173 = vmatprep.subr.mxu1 %v3412_v2  ;;  %3184 = vmatprep.mubr.msk.f32.mxu0 %vm3413_vm1, %v3412_v2  ;;  %v2013_v7 = vand.u32 4294901760, %v2012_v41 }
 0x120   : > { %3194 = vmatprep.subr.mxu0 %v3412_v2  ;;  %3164 = vmatmul.mubr.f32.vlgmr.msra.gmra.mxu1 %v3670_v46  ;;  %v2477_v23 = vsub.f32 %v2475_v12, %v2476_v19 }
 0x121   : > { %3174 = vmatpush3.msra.mxu1 %v3674_v62  ;;  %3185 = vmatmul.mubr.f32.vlgmr.msra.gmra.mxu0 %v3676_v3  ;;  %v849_v62 = vadd.f32 %v3121_v15, %v730_v17 }
 0x122   : > { %3195 = vmatpush3.msra.mxu0 %v1538_v39  ;;  %3175 = vmatprep.subr.mxu1 %v3412_v2 }
 0x123   : > { %3196 = vmatprep.subr.mxu0 %v3412_v2  ;;  %3176 = vmatpush3.msra.mxu1 %v3679_v6  ;;  %v964_v8 = vadd.f32 %v3137_v61, %v849_v62 }
 0x124   : > { %3197 = vmatpush3.msra.mxu0 %v1545_v40  ;;  %3177 = vmatprep.mubr.msk.f32.mxu1 %vm3413_vm1, %v3412_v2 }
 0x125   : > { %3187 = vmatprep.subr.mxu1 %v3412_v2  ;;  %3198 = vmatprep.mubr.msk.f32.mxu0 %vm3413_vm1, %v3412_v2  ;;  %v3789_v6 = vand.u32 4294901760, %v964_v8 }
 0x126   : > { %3208 = vmatprep.subr.mxu0 %v3412_v2  ;;  %3178 = vmatmul.mubr.f32.vlgmr.msra.gmra.mxu1 %v3652_v33 }
 0x127   : > { %3188 = vmatpush3.msra.mxu1 %v1541_v52  ;;  %3199 = vmatmul.mubr.f32.vlgmr.msra.gmra.mxu0 %v3661_v38  ;;  %v2468_v10 = vsub.f32 %v964_v8, %v3789_v6 }
 0x128   : > { %3209 = vmatpush3.msra.mxu0 %v1539_v18  ;;  %3189 = vmatprep.subr.mxu1 %v3412_v2 }
 0x129   : > { %3210 = vmatprep.subr.mxu0 %v3412_v2  ;;  %3190 = vmatpush3.msra.mxu1 %v1548_v54  ;;  %v2469_v14 = vand.u32 4294901760, %v2468_v10 }
 0x12a   : > { %3211 = vmatpush3.msra.mxu0 %v1546_v47  ;;  %3191 = vmatprep.mubr.msk.f32.mxu1 %vm3413_vm1, %v3412_v2 }
 0x12b   : > { %3201 = vmatprep.subr.mxu1 %v3412_v2  ;;  %3212 = vmatprep.mubr.msk.f32.mxu0 %vm3413_vm1, %v3412_v2  ;;  %v2470_v21 = vsub.f32 %v2468_v10, %v2469_v14 }
 0x12c   : > { %3222 = vmatprep.subr.mxu0 %v3412_v2  ;;  %3192 = vmatmul.mubr.f32.vlgmr.msra.gmra.mxu1 %v3652_v33 }
 0x12d   : > { %3202 = vmatpush3.msra.mxu1 %v3690_v25  ;;  %3213 = vmatmul.mubr.f32.vlgmr.msra.gmra.mxu0 %v3652_v33  ;;  %v2471_v24 = vand.u32 4294901760, %v2470_v21 }
 0x12e   : > { %3223 = vmatpush3.msra.mxu0 %v3739_v53  ;;  %3203 = vmatprep.subr.mxu1 %v3412_v2 }
 0x12f   : > { %3224 = vmatprep.subr.mxu0 %v3412_v2  ;;  %3204 = vmatpush3.msra.mxu1 %v3698_v29 }
 0x130   : > { %3225 = vmatpush3.msra.mxu0 %v3745_v56  ;;  %3205 = vmatprep.mubr.msk.f32.mxu1 %vm3413_vm1, %v3412_v2 }
 0x131   : > { %3215 = vmatprep.subr.mxu1 %v3412_v2  ;;  %3226 = vmatprep.mubr.msk.f32.mxu0 %vm3413_vm1, %v3412_v2 }
 0x132   : > { %3236 = vmatprep.subr.mxu0 %v3412_v2  ;;  %3206 = vmatmul.mubr.f32.vlgmr.msra.gmra.mxu1 %v3670_v46 }
 0x133   : > { %3216 = vmatpush3.msra.mxu1 %v3690_v25  ;;  %3227 = vmatmul.mubr.f32.vlgmr.msra.gmra.mxu0 %v3676_v3 }
 0x134   : > { %3237 = vmatpush3.msra.mxu0 %v2003_v59  ;;  %3217 = vmatprep.subr.mxu1 %v3412_v2 }
 0x135   : > { %3238 = vmatprep.subr.mxu0 %v3412_v2  ;;  %3218 = vmatpush3.msra.mxu1 %v3698_v29 }
 0x136   : > { %3239 = vmatpush3.msra.mxu0 %v2010_v60  ;;  %3219 = vmatprep.mubr.msk.f32.mxu1 %vm3413_vm1, %v3412_v2 }
 0x137   : > { %3229 = vmatprep.subr.mxu1 %v3412_v2  ;;  %3240 = vmatprep.mubr.msk.f32.mxu0 %vm3413_vm1, %v3412_v2 }
 0x138   : > { %3250 = vmatprep.subr.mxu0 %v3412_v2  ;;  %3220 = vmatmul.mubr.f32.vlgmr.msra.gmra.mxu1 %v3652_v33 }
 0x139   : > { %3230 = vmatpush3.msra.mxu1 %v2006_v5  ;;  %3241 = vmatmul.mubr.f32.vlgmr.msra.gmra.mxu0 %v3661_v38 }
 0x13a   : > { %3251 = vmatpush3.msra.mxu0 %v2004_v22  ;;  %3231 = vmatprep.subr.mxu1 %v3412_v2 }
 0x13b   : > { %3252 = vmatprep.subr.mxu0 %v3412_v2  ;;  %3232 = vmatpush3.msra.mxu1 %v2013_v7 }
 0x13c   : > { %3253 = vmatpush3.msra.mxu0 %v2011_v63  ;;  %3233 = vmatprep.mubr.msk.f32.mxu1 %vm3413_vm1, %v3412_v2 }
 0x13d   : > { %3243 = vmatprep.subr.mxu1 %v3412_v2  ;;  %3254 = vmatprep.mubr.msk.f32.mxu0 %vm3413_vm1, %v3412_v2 }
 0x13e   : > { %3264 = vmatprep.subr.mxu0 %v3412_v2  ;;  %3234 = vmatmul.mubr.f32.vlgmr.msra.gmra.mxu1 %v3652_v33 }
 0x13f   : > { %3244 = vmatpush3.msra.mxu1 %v3739_v53  ;;  %3255 = vmatmul.mubr.f32.vlgmr.msra.gmra.mxu0 %v3652_v33 }
 0x140   : > { %3265 = vmatpush3.msra.mxu0 %v3789_v6  ;;  %3245 = vmatprep.subr.mxu1 %v3412_v2 }
 0x141   : > { %3266 = vmatprep.subr.mxu0 %v3412_v2  ;;  %3246 = vmatpush3.msra.mxu1 %v3745_v56 }
 0x142   : > { %3267 = vmatpush3.msra.mxu0 %v2393_v9  ;;  %3247 = vmatprep.mubr.msk.f32.mxu1 %vm3413_vm1, %v3412_v2 }
 0x143   : > { %3257 = vmatprep.subr.mxu1 %v3412_v2  ;;  %3268 = vmatprep.mubr.msk.f32.mxu0 %vm3413_vm1, %v3412_v2 }
 0x144   : > { %3278 = vmatprep.subr.mxu0 %v3412_v2  ;;  %3248 = vmatmul.mubr.f32.vlgmr.msra.gmra.mxu1 %v3670_v46 }
 0x145   : > { %3258 = vmatpush3.msra.mxu1 %v3739_v53  ;;  %3269 = vmatmul.mubr.f32.vlgmr.msra.gmra.mxu0 %v3676_v3  ;;  %v2478_v3 = vand.u32 4294901760, %v2477_v23 }
 0x146   : > { %3279 = vmatpush3.msra.mxu0 %v2468_v10  ;;  %3259 = vmatprep.subr.mxu1 %v3412_v2 }
 0x147   : > { %3280 = vmatprep.subr.mxu0 %v3412_v2  ;;  %3260 = vmatpush3.msra.mxu1 %v3745_v56 }
 0x148   : > { %3281 = vmatpush3.msra.mxu0 %v2475_v12  ;;  %3261 = vmatprep.mubr.msk.f32.mxu1 %vm3413_vm1, %v3412_v2 }
 0x149   : > { %3271 = vmatprep.subr.mxu1 %v3412_v2  ;;  %3282 = vmatprep.mubr.msk.f32.mxu0 %vm3413_vm1, %v3412_v2 }
 0x14a   : > { %3292 = vmatprep.subr.mxu0 %v3412_v2  ;;  %3262 = vmatmul.mubr.f32.vlgmr.msra.gmra.mxu1 %v3652_v33 }
 0x14b   : > { %3272 = vmatpush3.msra.mxu1 %v2471_v24  ;;  %3283 = vmatmul.mubr.f32.vlgmr.msra.gmra.mxu0 %v3661_v38 }
 0x14c   : > { %3293 = vmatpush3.msra.mxu0 %v2469_v14  ;;  %3273 = vmatprep.subr.mxu1 %v3412_v2 }
 0x14d   : > { %3294 = vmatprep.subr.mxu0 %v3412_v2  ;;  %3274 = vmatpush3.msra.mxu1 %v2478_v3 }
 0x14e   : > { %3295 = vmatpush3.msra.mxu0 %v2476_v19  ;;  %3275 = vmatprep.mubr.msk.f32.mxu1 %vm3413_vm1, %v3412_v2 }
 0x14f   : > { %3285 = vmatprep.subr.mxu1 %v3412_v2  ;;  %3276 = vmatmul.mubr.f32.vlgmr.msra.gmra.mxu1 %v3652_v33 }
 0x150   : > { %3286 = vmatpush3.msra.mxu1 %v3789_v6  ;;  %3289 = vmatprep.mubr.msk.f32.mxu1 %vm3413_vm1, %v3412_v2 }
 0x151   : > { %3287 = vmatprep.subr.mxu1 %v3412_v2  ;;  %3296 = vmatprep.mubr.msk.f32.mxu0 %vm3413_vm1, %v3412_v2 }
 0x152   : > { %3288 = vmatpush3.msra.mxu1 %v2393_v9  ;;  %3297 = vmatmul.mubr.f32.vlgmr.msra.gmra.mxu0 %v3652_v33 }
 0x153   : > { %3299 = vmatprep.subr.mxu1 %v3412_v2  ;;  %3290 = vmatmul.mubr.f32.vlgmr.msra.gmra.mxu1 %v3670_v46 }
 0x154   : > { %3300 = vmatpush3.msra.mxu1 %v3789_v6  ;;  %3303 = vmatprep.mubr.msk.f32.mxu1 %vm3413_vm1, %v3412_v2 }
 0x155   : > { %3301 = vmatprep.subr.mxu1 %v3412_v2 }
 0x156   : > { %3302 = vmatpush3.msra.mxu1 %v2393_v9 }
 0x157   : > { %3304 = vmatmul.mubr.f32.vlgmr.msra.gmra.mxu1 %v3652_v33 }
 0x1d1   : > { %v1043_v38 = vpop.f32.mrf.mxu0 }
 0x1d3   : > { %v3144_v25 = vpop.f32.mrf.mxu0 }
 0x1d5   : > { %v1200_v26 = vpop.f32.mrf.mxu0 }
 0x1d7   : > { %v3158_v27 = vpop.f32.mrf.mxu0 }
 0x1da   : > { %v1124_v29 = vpop.f32.mrf.mxu1 }
 0x1db   : > { %v1125_v30 = vadd.f32 %v1124_v29, %v1043_v38  ;;  %v1352_v32 = vpop.f32.mrf.mxu0 }
 0x1dc   : > { %v3151_v46 = vpop.f32.mrf.mxu1 }
 0x1dd   : > { %v1201_v36 = vadd.f32 %v1200_v26, %v1125_v30  ;;  %v3172_v39 = vpop.f32.mrf.mxu0 }
 0x1e0   : > { %v1275_v11 = vpop.f32.mrf.mxu1 }
 0x1e1   : > { %v1276_v16 = vadd.f32 %v1275_v11, %v1201_v36  ;;  %v1504_v40 = vpop.f32.mrf.mxu0 }
 0x1e2   : > { %v3165_v13 = vpop.f32.mrf.mxu1 }
 0x1e3   : > { %v1353_v2 = vadd.f32 %v1352_v32, %v1276_v16  ;;  %v3186_v18 = vpop.f32.mrf.mxu0 }
 0x1e6   : > { %v1425_v33 = vpop.f32.mrf.mxu1 }
 0x1e7   : > { %v1426_v35 = vadd.f32 %v1425_v33, %v1353_v2  ;;  %v1661_v43 = vpop.f32.mrf.mxu0 }
 0x1e8   : > { %v3179_v37 = vpop.f32.mrf.mxu1 }
 0x1e9   : > { %v3200_v44 = vpop.f32.mrf.mxu0  ;;  %1430 = vst.msk [vmem:[%s3851_s10] sm:$0xff] %vm1429_vm2, %v1426_v35 }
 0x1ec   : > { %v1585_v47 = vpop.f32.mrf.mxu1 }
 0x1ed   : > { %v1586_v28 = vadd.f32 %v1585_v47, %v1504_v40  ;;  %v1813_v48 = vpop.f32.mrf.mxu0 }
 0x1ee   : > { %v3193_v49 = vpop.f32.mrf.mxu1 }
 0x1ef   : > { %v1662_v31 = vadd.f32 %v1661_v43, %v1586_v28  ;;  %v3214_v50 = vpop.f32.mrf.mxu0 }
 0x1f2   : > { %v1736_v51 = vpop.f32.mrf.mxu1 }
 0x1f3   : > { %v1737_v52 = vadd.f32 %v1736_v51, %v1662_v31  ;;  %v1969_v53 = vpop.f32.mrf.mxu0 }
 0x1f4   : > { %v3207_v54 = vpop.f32.mrf.mxu1 }
 0x1f5   : > { %v1814_v55 = vadd.f32 %v1813_v48, %v1737_v52  ;;  %v3228_v56 = vpop.f32.mrf.mxu0 }
 0x1f8   : > { %v1886_v57 = vpop.f32.mrf.mxu1 }
 0x1f9   : > { %v1887_v58 = vadd.f32 %v1886_v57, %v1814_v55  ;;  %v2126_v59 = vpop.f32.mrf.mxu0 }
 0x1fa   : > { %v3221_v15 = vpop.f32.mrf.mxu1 }
 0x1fb   : > { %1891 = vrot.lane.b32.xlu0 %v1887_v58, %s3414_s11  ;;  %v3242_v20 = vpop.f32.mrf.mxu0 }
 0x1fe   : > { %v2050_v60 = vpop.f32.mrf.mxu1 }
 0x1ff   : > { %v2051_v17 = vadd.f32 %v2050_v60, %v1969_v53  ;;  %v2278_v22 = vpop.f32.mrf.mxu0 }
 0x200   : > { %v3235_v42 = vpop.f32.mrf.mxu1 }
 0x201   : > { %v2127_v61 = vadd.f32 %v2126_v59, %v2051_v17  ;;  %v3256_v45 = vpop.f32.mrf.mxu0 }
 0x204   : > { %v2201_v62 = vpop.f32.mrf.mxu1 }
 0x205   : > { %v2202_v63 = vadd.f32 %v2201_v62, %v2127_v61  ;;  %v2434_v34 = vpop.f32.mrf.mxu0 }
 0x206   : > { %v3249_v0 = vpop.f32.mrf.mxu1 }
 0x207   : > { %v2279_v1 = vadd.f32 %v2278_v22, %v2202_v63  ;;  %v3270_v41 = vpop.f32.mrf.mxu0 }
 0x20a   : > { %v2351_v8 = vpop.f32.mrf.mxu1 }
 0x20b   : > { %v2352_v4 = vadd.f32 %v2351_v8, %v2279_v1  ;;  %v2591_v5 = vpop.f32.mrf.mxu0 }
 0x20c   : > { %v3263_v6 = vpop.f32.mrf.mxu1 }
 0x20d   : > { %2356 = vrot.lane.b32.xlu0 %v2352_v4, %s3415_s17  ;;  %v3284_v7 = vpop.f32.mrf.mxu0 }
 0x20f   : > { %v2515_v9 = vpop.f32.mrf.mxu1 }
 0x210   : > { %v2516_v10 = vadd.f32 %v2515_v9, %v2434_v34 }
 0x211   : > { %v3277_v12 = vpop.f32.mrf.mxu1 }
 0x212   : > { %v2592_v14 = vadd.f32 %v2591_v5, %v2516_v10  ;;  %v2743_v19 = vpop.f32.mrf.mxu0 }
 0x213   : > { %v2666_v21 = vpop.f32.mrf.mxu1 }
 0x214   : > { %v2667_v23 = vadd.f32 %v2666_v21, %v2592_v14  ;;  %v3298_v24 = vpop.f32.mrf.mxu0 }
 0x215   : > { %v3291_v3 = vpop.f32.mrf.mxu1 }
 0x216   : > { %v2744_v38 = vadd.f32 %v2743_v19, %v2667_v23 }
 0x217   : > { %v2816_v25 = vpop.f32.mrf.mxu1 }
 0x218   : > { %v2817_v26 = vadd.f32 %v2816_v25, %v2744_v38 }
 0x219   : > { %v3305_v27 = vpop.f32.mrf.mxu1 }
 0x21a   : > { %2821 = vrot.lane.b32.xlu1 %v2817_v26, %s3416_s19 }
 0x26d   : > { %v1892_v29 = vpop.permute.xlu0 %1891 }
 0x26e   : > { %1895 = vst.msk [vmem:[%s3851_s10] sm:$0xff] %vm1894_vm3, %v1892_v29 }
 0x27f   : > { %v2357_v30 = vpop.permute.xlu0 %2356 }
 0x280   : > { %2360 = vst.msk [vmem:[%s3851_s10] sm:$0xff] %vm2359_vm4, %v2357_v30 }
 0x28c   : > { %v2822_v32 = vpop.permute.xlu1 %2821 }
 0x28d   : > { %2825 = vst.msk [vmem:[%s3851_s10] sm:$0xff] %vm2824_vm5, %v2822_v32 }
 0x28e   : > { %3363 = shalt.err (!%p3360_p3)
}
 0x28f   : > { %s3364_s5 = scalar_lea.hbm %s3861_s27, 128  ;;  %s3368_s8 = scalar_lea.hbm %s3902_s3, 256 }
 0x290   : > { %p3365_p4 = scmp.ne.s32.totalorder %s3861_s27, %s3364_s5  ;;  %p3369_p9 = scmp.lt.s32.totalorder %s3861_s27, %s3902_s3 }
 0x291   : > { %p3370_p10 = scmp.lt.s32.totalorder %s3368_s8, %s3364_s5 }
 0x292   : > { %p3366_p7 = pnand %p3365_p4, %p3476_p5 }
 0x293   : > { %p3371_p11 = por %p3370_p10, %p3369_p9 }
 0x294   : > { %p3367_p8 = pneg %p3366_p7 }
 0x296   : > { %p3372_p12 = pnand %p3371_p11, %p3367_p8 }
 0x298   : > { %3375 = shalt.err (!%p3372_p12)
}
 0x299   : > { %3306 = dma.vmem_to_hbm [thread:$0]  (%p3476_p5), %s2841_s24, 128, %s3861_s27, %s2827_s28  }
 0x29a PF: > { %p3312_p13 = scmp.ge.s32.totalorder %s3410_s15, 2  ;;  %s2852_s11 = sand.u32 1, %s3398_s12  }
 0x29b   : > { %s2853_s17 = scalar_lea.sflag [#allocation3], %s2852_s11 }
 0x29c   : > { %p3309_p0 = pnand %p3312_p13, %p3480_p6 }
 0x29e   : > { %p3310_p1 = pneg %p3309_p0 }
 0x2a0   : > { %3393 = dma.done.wait (%p3310_p1), %s2853_s17, 128  }
 0x2a1   : > { %3395 = vsyncadd (%p3310_p1), %s2853_s17, 4294967168  ;;  %p13_p2 = scmp.ge.s32.totalorder %s3463_s18, 4   ;;  %s3905_s12 = smov %s3402_s13 }
 0x2a2   : > { %s3906_s13 = smov %s3406_s14  ;;  %s3907_s14 = smov %s3474_s21 }
 0x2a3   : > { %s3908_s15 = smov %s3463_s18  ;;  %15 = sbr.rel (!%p13_p2) target bundleno = 3 (0x3), region = 67 }
 0x2a8   :  { %2858 = vsyncpa [#allocation3], 1 }
 0x2a9   :  { %2860 = vsyncpa [#allocation3 + $0x1], 1 }

</bundles_post_ra>
